<compile_context>
chip_gen: v7x
topology: tpu7x:2x2x1
jax: 0.10.0
libtpu: 0.0.40
codegen_flags: <defaults>
</compile_context>

<pallas_src>
import numpy as np
import jax
import jax.numpy as jnp
from jax.experimental import pallas as pl
from jax.experimental.pallas import tpu as pltpu

_LANE = 128            # TPU vreg lane width
_MAX_TILE_ROWS = 2048  # 2048 x 128 x 4B = 1 MiB per buffer -> safe on all gens


def build_grid(resolution):
    """JAX port of the PyTorch build_grid: returns (1, H, W, 4) float32."""
    ranges = [np.linspace(0.0, 1.0, num=res) for res in resolution]
    grid = np.meshgrid(*ranges, sparse=False, indexing="ij")
    grid = np.stack(grid, axis=-1)
    grid = np.reshape(grid, [resolution[0], resolution[1], -1])
    grid = np.expand_dims(grid, axis=0).astype(np.float32)
    grid = np.concatenate([grid, 1.0 - grid], axis=-1)  # (1, H, W, 4)
    return jnp.asarray(grid)


def _add_pos_kernel(pos_ref, x_ref, o_ref):
    # pos_ref / x_ref / o_ref: (1, T, L); pos is shared across the batch axis.
    # Accumulate in f32, cast once on store.
    o_ref[...] = (x_ref[...].astype(jnp.float32) + pos_ref[...]).astype(o_ref.dtype)


def _pick_row_tile(n_rows):
    """Largest row tile <= _MAX_TILE_ROWS that divides n_rows.

    If n_rows fits the cap, use it directly (full-extent block, always legal).
    Otherwise pick the biggest multiple-of-8 divisor <= cap; if none exists,
    fall back to the full extent (still legal, just a bigger VMEM footprint).
    """
    if n_rows <= _MAX_TILE_ROWS:
        return n_rows
    for t in range(_MAX_TILE_ROWS, 0, -8):
        if n_rows % t == 0:
            return t
    return n_rows


def soft_position_embed(inputs, grid, weight, bias):
    """inputs: (B, H, W, C); grid: (1, H, W, 4); weight: (4, C); bias: (C,)."""
    B, H, W, C = inputs.shape
    HW = H * W

    # Hoisted, batch-independent positional embedding (tiny; let XLA handle it).
    pos = (
        jnp.dot(grid.reshape(HW, 4), weight, preferred_element_type=jnp.float32)
        + bias.astype(jnp.float32)
    )  # (HW, C) f32

    total = HW * C
    if total % _LANE == 0:
        # Lane-dense view: last dim = 128 -> full-width unmasked vector stores.
        lanes = _LANE
        n_rows = total // _LANE
    else:
        # Fallback layout (stores are lane-masked if C < 128).
        lanes = C
        n_rows = HW

    x3 = inputs.reshape(B, n_rows, lanes)
    pos3 = pos.reshape(1, n_rows, lanes)

    t_rows = _pick_row_tile(n_rows)
    n_tiles = n_rows // t_rows

    out = pl.pallas_call(
        _add_pos_kernel,
        out_shape=jax.ShapeDtypeStruct((B, n_rows, lanes), inputs.dtype),
        grid=(B, n_tiles),
        in_specs=[
            # pos: shared across batch, tiled over rows.
            pl.BlockSpec((1, t_rows, lanes), lambda b, t: (0, t, 0)),
            # x: per-batch, per-row-tile.
            pl.BlockSpec((1, t_rows, lanes), lambda b, t: (b, t, 0)),
        ],
        out_specs=pl.BlockSpec((1, t_rows, lanes), lambda b, t: (b, t, 0)),
        compiler_params=pltpu.CompilerParams(
            dimension_semantics=("parallel", "parallel")),
    )(pos3, x3)

    return out.reshape(B, H, W, C)


if __name__ == "__main__":
    # Small shapes: batch=2, resolution=(16,16), hidden=32
    B, H, W, C = 2, 16, 16, 32
    resolution = (H, W)

    key = jax.random.PRNGKey(0)
    k_x, k_w, k_b = jax.random.split(key, 3)

    inputs = jax.random.normal(k_x, (B, H, W, C), dtype=jnp.float32)
    # Linear(4, C) parameters stored as (4, C) so pos = grid @ W + b matches
    # PyTorch's x @ weight.T + b.
    weight = jax.random.normal(k_w, (4, C), dtype=jnp.float32) * 0.5
    bias = jax.random.normal(k_b, (C,), dtype=jnp.float32) * 0.1

    grid = build_grid(resolution)  # (1, H, W, 4)

    out = soft_position_embed(inputs, grid, weight, bias)
    out = jax.block_until_ready(out)

    # Pure-JAX reference check
    ref = inputs + (jnp.einsum("lhwk,kc->lhwc", grid, weight) + bias)
    np.testing.assert_allclose(np.asarray(out), np.asarray(ref),
                               rtol=1e-5, atol=1e-5)
    print("KERNEL_OK")
</pallas_src>

<mosaic_0001>
module attributes {stable_mosaic.version = 11 : i64} {
  func.func @_add_pos_kernel(%arg0: i32, %arg1: i32, %arg2: memref<1x64x128xf32, #tpu.memory_space<vmem>>, %arg3: memref<1x64x128xf32, #tpu.memory_space<vmem>>, %arg4: memref<1x64x128xf32, #tpu.memory_space<vmem>>) attributes {dimension_semantics = [#tpu.dimension_semantics<parallel>, #tpu.dimension_semantics<parallel>], iteration_bounds = array<i64: 2, 1>, scalar_prefetch = 0 : i64, scratch_operands = 0 : i64, tpu.core_type = #tpu.core_type<tc>, window_params = [{transform_indices = @transform_0, window_bounds = array<i64: 1, 64, 128>}, {transform_indices = @transform_1, window_bounds = array<i64: 1, 64, 128>}, {transform_indices = @transform_2, window_bounds = array<i64: 1, 64, 128>}]} {
    %c0 = arith.constant 0 : index
    %c0_0 = arith.constant 0 : index
    %c0_1 = arith.constant 0 : index
    %0 = vector.load %arg3[%c0, %c0_0, %c0_1] : memref<1x64x128xf32, #tpu.memory_space<vmem>>, vector<1x64x128xf32>
    %c0_2 = arith.constant 0 : index
    %c0_3 = arith.constant 0 : index
    %c0_4 = arith.constant 0 : index
    %1 = vector.load %arg2[%c0_2, %c0_3, %c0_4] : memref<1x64x128xf32, #tpu.memory_space<vmem>>, vector<1x64x128xf32>
    %2 = arith.addf %0, %1 : vector<1x64x128xf32>
    %c0_5 = arith.constant 0 : index
    %c0_6 = arith.constant 0 : index
    %c0_7 = arith.constant 0 : index
    %3 = vector.load %arg4[%c0_5, %c0_6, %c0_7] : memref<1x64x128xf32, #tpu.memory_space<vmem>>, vector<1x64x128xf32>
    tpu.vector_store %arg4[%c0_5, %c0_6, %c0_7], %2 {strides = array<i32>} : memref<1x64x128xf32, #tpu.memory_space<vmem>>, vector<1x64x128xf32>,
    return
  }
  func.func @transform_0(%arg0: i32, %arg1: i32) -> (i32, i32, i32) {
    %c0_i32 = arith.constant 0 : i32
    %c0_i32_0 = arith.constant 0 : i32
    %c0_i32_1 = arith.constant 0 : i32
    return %c0_i32, %arg1, %c0_i32_0 : i32, i32, i32
  }
  func.func @transform_1(%arg0: i32, %arg1: i32) -> (i32, i32, i32) {
    %c0_i32 = arith.constant 0 : i32
    %c0_i32_0 = arith.constant 0 : i32
    return %arg0, %arg1, %c0_i32 : i32, i32, i32
  }
  func.func @transform_2(%arg0: i32, %arg1: i32) -> (i32, i32, i32) {
    %c0_i32 = arith.constant 0 : i32
    %c0_i32_0 = arith.constant 0 : i32
    return %arg0, %arg1, %c0_i32 : i32, i32, i32
  }
}

</mosaic_0001>

<bundles_post_ra>
// kernel: tpu_custom_call.1
= control target key start
LH: loop header
LB: loop body
LE: loop exit
PB: predicated region body
PF: predicated region fallthrough
CT: control target
= control target key end

     0   :  { %7 = vsyncpa [#allocation3], 0  ;;  %s844_s0 = inlined_call_operand.hbm [shape: f32[1,64,128], index: 0, kind: input, shape index: {}]   ;;  %s845_s1 = inlined_call_operand.hbm [shape: f32[2,64,128], index: 1, kind: input, shape index: {}]   ;;  %s846_s2 = inlined_call_operand.hbm [shape: f32[2,64,128], index: 2, kind: output, shape index: {}]  }
   0x1   :  { %8 = vsyncpa [#allocation6], 0 }
   0x2   :  { %10 = vsyncpa [#allocation6 + $0x1], 0 }
   0x3   :  { %11 = vsyncpa [#allocation4], 0 }
   0x4   :  { %13 = vsyncpa [#allocation4 + $0x1], 0  ;;  %s619_s9 = smov 0   ;;  %s621_s10 = smov 0  }
   0x5   :  { %s623_s11 = smov 0   ;;  %s625_s12 = smov 0  }
   0x6   :  { %s627_s13 = smov 0   ;;  %s629_s14 = smov 0  }
   0x7 LB: > { %s355_s15 = sadd.s32 4294967295, %s595_s14   ;;  %s356_s16 = sadd.s32 4294967294, %s595_s14   ;;  %s595_s14 = sphi %s629_s14, %s19_s14   ;;  %s591_s13 = sphi %s627_s13, %s870_s13   ;;  %s587_s12 = sphi %s625_s12, %s869_s12   ;;  %s583_s11 = sphi %s623_s11, %s868_s11   ;;  %s579_s10 = sphi %s621_s10, %s867_s10   ;;  %s575_s9 = sphi %s619_s9, %s866_s9  }
   0x8   : > { %p79_p0 = scmp.ne.s32.totalorder %s579_s10, %s575_s9  ;;  %p653_p1 = scmp.eq.s32.totalorder %s355_s15, 0 }
   0x9   : > { %p657_p2 = scmp.eq.s32.totalorder %s355_s15, 1  ;;  %p111_p3 = scmp.eq.s32.totalorder %s356_s16, 1 }
   0xa   : > { %s851_s17 = scalar_select %p653_p1, 1, 0 }
   0xb   : > { %s852_s18 = scalar_select %p657_p2, 1, 0 }
   0xc   : > { %p663_p4 = por %p653_p1, %p79_p0  ;;  %p357_p5 = scmp.ge.s32.totalorder %s595_s14, 1 }
   0xd   : > { %p668_p6 = por %p111_p3, %p79_p0  ;;  %p118_p7 = scmp.lt.s32.totalorder %s595_s14, 3 }
   0xe   : > { %s853_s19 = scalar_select %p663_p4, 1, 0 }
   0xf   : > { %s854_s20 = scalar_select %p668_p6, 1, 0 }
  0x10   : > { %p673_p8 = pnand %p357_p5, %p118_p7  ;;  %s597_s22 = smov [#allocation2]  }
  0x11   : > { %s133_s23 = sshll.u32 %s597_s22, 4  ;;  %s31_s25 = sadd.s32 1, %s591_s13  ;;  %s134_s23 = int_to_ptr.vmem [resolvable:$true] %s133_s23 }
  0x12   : > { %s855_s21 = scalar_select %p673_p8, 1, 0 }
  0x13   : > { %p382_p9 = pneg %p673_p8  ;;  %s451_s28 = scalar_lea.hbm %s844_s0, 1024 }
  0x14   : > { %p452_p12 = scmp.ne.s32.totalorder %s844_s0, %s451_s28  ;;  %p458_p5 = scmp.lt.u32.totalorder %s451_s28, %s844_s0 }
  0x15   : > { %p682_p11 = pnand %p382_p9, %p653_p1 }
  0x17   : > { %p453_p13 = pneg %p682_p11 }
  0x19   : > { %p454_p0 = pnand %p453_p13, %p452_p12 }
  0x1b   : > { %p455_p3 = pneg %p454_p0 }
  0x1d   : > { %p460_p7 = pnand %p458_p5, %p455_p3 }
  0x1f   : > { %463 = shalt.err (!%p460_p7)
}
  0x20   : > { %s464_s5 = scalar_lea.vmem %s134_s23, 1024  ;;  %p472_p4 = scmp.lt.s32.totalorder %s134_s23, %s134_s23 }
  0x21   : > { %p465_p9 = scmp.ne.s32.totalorder %s134_s23, %s464_s5  ;;  %p473_p1 = scmp.lt.s32.totalorder %s464_s5, %s464_s5 }
  0x23   : > { %p467_p10 = pnand %p465_p9, %p453_p13  ;;  %p474_p8 = por %p473_p1, %p472_p4 }
  0x25   : > { %p468_p6 = pneg %p467_p10 }
  0x27   : > { %p475_p2 = pnand %p474_p8, %p468_p6 }
  0x29   : > { %478 = shalt.err (!%p475_p2)
}
  0x2a   : > { %s598_s6 = smov 128   ;;  %s599_s7 = smov 8  }
  0x2b   : > { %385 = dma.hbm_to_vmem [thread:$0]  (!%p682_p11), %s844_s0, 1024, %s134_s23, [#allocation3], %s598_s6, %s598_s6, %s599_s7  }
  0x2c   : > { %p33_p1 = scmp.ge.s32.totalorder %s31_s25, 2  ;;  %s66_s16 = sadd.s32 1, %s583_s11 }
  0x2d   : > { %p73_p2 = scmp.ne.s32.totalorder %s583_s11, %s579_s10  ;;  %p74_p4 = scmp.eq.s32.totalorder %s595_s14, 0 }
  0x2e   : > { %s872_s25 = smov (%p33_p1, %s31_s25), 0  ;;  %p858_p8 = scmp.ne.s32.totalorder %s852_s18, 0 }
  0x2f   : > { %p712_p6 = por %p74_p4, %p73_p2  ;;  %s61_s26 = ssub.s32 %s591_s13, %s872_s25 }
  0x30   : > { %p718_p10 = por %p858_p8, %p73_p2  ;;  %p395_p12 = scmp.lt.s32.totalorder %s595_s14, 2 }
  0x31   : > { %p64_p11 = scmp.eq.s32.totalorder %s61_s26, 0  ;;  %s147_s23 = sand.u32 1, %s583_s11  }
  0x32   : > { %s360_s27 = sshll.u32 %s147_s23, 6  ;;  %s372_s29 = sshll.u32 %s591_s13, 10 }
  0x33   : > { %s727_s28 = scalar_select %p64_p11, %s583_s11, %s66_s16  }
  0x34   : > { %s733_s4 = scalar_lea.hbm %s845_s1, %s372_s29  ;;  %s151_s18 = scalar_lea.vmem [#allocation5], %s360_s27 }
  0x35   : > { %s160_s5 = sshll.u32 %s151_s18, 4  ;;  %p739_p13 = pnand %p395_p12, %p712_p6  ;;  %s735_s5 = int_to_ptr.vmem [resolvable:$true] %s160_s5 }
  0x36   : > { %s743_s15 = scalar_lea.sflag [#allocation6], %s147_s23  ;;  %s479_s16 = scalar_lea.hbm %s733_s4, 1024 }
  0x37   : > { %p480_p0 = scmp.ne.s32.totalorder %s733_s4, %s479_s16  ;;  %p481_p3 = pneg %p739_p13 }
  0x38   : > { %s484_s22 = scalar_lea.hbm %s845_s1, 2048  ;;  %p485_p9 = scmp.lt.u32.totalorder %s733_s4, %s845_s1 }
  0x39   : > { %p482_p5 = pnand %p481_p3, %p480_p0  ;;  %p486_p1 = scmp.lt.u32.totalorder %s484_s22, %s479_s16 }
  0x3a   : > { %p488_p4 = scmp.lt.u32.totalorder %s479_s16, %s733_s4 }
  0x3b   : > { %p483_p7 = pneg %p482_p5  ;;  %p487_p2 = por %p486_p1, %p485_p9 }
  0x3d   : > { %p489_p6 = por %p488_p4, %p487_p2 }
  0x3f   : > { %p490_p8 = pnand %p489_p6, %p483_p7 }
  0x41   : > { %493 = shalt.err (!%p490_p8)
}
  0x42   : > { %s494_s23 = scalar_lea.vmem %s735_s5, 1024  ;;  %s600_s3 = smov [#allocation5]  }
  0x43   : > { %p495_p12 = scmp.ne.s32.totalorder %s735_s5, %s494_s23  ;;  %s499_s18 = sshll.u32 %s600_s3, 4  ;;  %s500_s18 = int_to_ptr.vmem [resolvable:$false] %s499_s18 }
  0x44   : > { %s501_s26 = scalar_lea.vmem %s500_s18, 2048  ;;  %p502_p5 = scmp.lt.s32.totalorder %s735_s5, %s500_s18 }
  0x45   : > { %p497_p11 = pnand %p495_p12, %p481_p3  ;;  %p503_p9 = scmp.lt.s32.totalorder %s501_s26, %s494_s23 }
  0x47   : > { %p498_p0 = pneg %p497_p11  ;;  %p504_p1 = por %p503_p9, %p502_p5 }
  0x49   : > { %p505_p2 = pnand %p504_p1, %p498_p0 }
  0x4b   : > { %508 = shalt.err (!%p505_p2)
}
  0x4c   : > { %389 = dma.hbm_to_vmem [thread:$0]  (!%p739_p13), %s733_s4, 1024, %s735_s5, %s743_s15, %s598_s6, %s598_s6, %s599_s7  }
  0x4d   : > { %p861_p3 = scmp.ne.s32.totalorder %s855_s21, 0 }
  0x4e   : > { %p862_p7 = scmp.ne.s32.totalorder (!%p861_p3), %s851_s17, 0 }
  0x4f   : > { %172 = sbr.rel (%p861_p3) target bundleno = 117 (0x75), region = 28 }
  0x56   : > { %562 = dma.done.wait (%p862_p7), [#allocation3], 1024  }
  0x57   : > { %564 = vsyncadd (%p862_p7), [#allocation3], 4294966272  ;;  %s781_s16 = sand.u32 1, %s579_s10   ;;  %p863_p4 = scmp.ne.s32.totalorder %s853_s19, 0 }
  0x58   : > { %s365_s8 = sshll.u32 %s781_s16, 6  ;;  %s179_s27 = scalar_lea.sflag [#allocation6], %s781_s16 }
  0x59   : > { %s182_s22 = scalar_lea.vmem [#allocation5], %s365_s8 }
  0x5a   : > { %566 = dma.done.wait (%p863_p4), %s179_s27, 1024  }
  0x5b   : > { %568 = vsyncadd (%p863_p4), %s179_s27, 4294966272  ;;  %v206_v0 = vld [vmem:[%s182_s22] sm:$0xff]  ;;  %v207_v2 = vld [vmem:[%s182_s22 + $0x8] sm:$0xff]  ;;  %s202_s17 = scalar_lea.vmem [#allocation7], %s365_s8  ;;  %s373_s6 = sshll.u32 %s587_s12, 10 }
  0x5c   : > { %v214_v1 = vld [vmem:[#allocation2] sm:$0xff]  ;;  %v215_v4 = vld [vmem:[#allocation2 + $0x8] sm:$0xff]  ;;  %v208_v5 = vld [vmem:[%s182_s22 + $0x10] sm:$0xff]  ;;  %s254_s21 = sshll.u32 %s202_s17, 4  ;;  %s795_s7 = scalar_lea.hbm %s846_s2, %s373_s6  ;;  %s790_s21 = int_to_ptr.vmem [resolvable:$true] %s254_s21 }
  0x5d   : > { %v222_v3 = vadd.f32 %v214_v1, %v206_v0  ;;  %v216_v6 = vld [vmem:[#allocation2 + $0x10] sm:$0xff]  ;;  %v223_v7 = vadd.f32 %v215_v4, %v207_v2  ;;  %v209_v9 = vld [vmem:[%s182_s22 + $0x18] sm:$0xff]  ;;  %v210_v11 = vld [vmem:[%s182_s22 + $0x20] sm:$0xff]  ;;  %s239_s4 = scalar_lea.sflag [#allocation4], %s781_s16  ;;  %s509_s5 = scalar_lea.vmem %s790_s21, 1024 }
  0x5e   : > { %v224_v8 = vadd.f32 %v216_v6, %v208_v5  ;;  %v217_v10 = vld [vmem:[#allocation2 + $0x18] sm:$0xff]  ;;  %v218_v13 = vld [vmem:[#allocation2 + $0x20] sm:$0xff]  ;;  %v211_v14 = vld [vmem:[%s182_s22 + $0x28] sm:$0xff]  ;;  %p510_p13 = scmp.ne.s32.totalorder %s790_s21, %s509_s5  ;;  %s601_s15 = smov [#allocation7]  }
  0x5f   : > { %230 = vst [vmem:[%s202_s17] sm:$0xff] %v222_v3  ;;  %v225_v12 = vadd.f32 %v217_v10, %v209_v9  ;;  %v219_v15 = vld [vmem:[#allocation2 + $0x28] sm:$0xff]  ;;  %231 = vst [vmem:[%s202_s17 + $0x8] sm:$0xff] %v223_v7  ;;  %v226_v16 = vadd.f32 %v218_v13, %v210_v11  ;;  %v212_v18 = vld [vmem:[%s182_s22 + $0x30] sm:$0xff]  ;;  %s513_s29 = sshll.u32 %s601_s15, 4  ;;  %s514_s29 = int_to_ptr.vmem [resolvable:$false] %s513_s29 }
  0x60   : > { %232 = vst [vmem:[%s202_s17 + $0x10] sm:$0xff] %v224_v8  ;;  %v227_v17 = vadd.f32 %v219_v15, %v211_v14  ;;  %v220_v19 = vld [vmem:[#allocation2 + $0x30] sm:$0xff]  ;;  %v213_v20 = vld [vmem:[%s182_s22 + $0x38] sm:$0xff]  ;;  %p511_p6 = pnand %p510_p13, %p718_p10  ;;  %s515_s30 = scalar_lea.vmem %s514_s29, 2048 }
  0x61   : > { %233 = vst [vmem:[%s202_s17 + $0x18] sm:$0xff] %v225_v12  ;;  %v228_v21 = vadd.f32 %v220_v19, %v212_v18  ;;  %v221_v22 = vld [vmem:[#allocation2 + $0x38] sm:$0xff]  ;;  %234 = vst [vmem:[%s202_s17 + $0x20] sm:$0xff] %v226_v16  ;;  %p516_p12 = scmp.lt.s32.totalorder %s790_s21, %s514_s29  ;;  %p517_p11 = scmp.lt.s32.totalorder %s515_s30, %s509_s5 }
  0x62   : > { %235 = vst [vmem:[%s202_s17 + $0x28] sm:$0xff] %v227_v17  ;;  %v229_v23 = vadd.f32 %v221_v22, %v213_v20  ;;  %p512_p8 = pneg %p511_p6 }
  0x63   : > { %236 = vst [vmem:[%s202_s17 + $0x30] sm:$0xff] %v228_v21  ;;  %p518_p0 = por %p517_p11, %p516_p12 }
  0x64   : > { %237 = vst [vmem:[%s202_s17 + $0x38] sm:$0xff] %v229_v23 }
  0x65   : > { %p519_p5 = pnand %p518_p0, %p512_p8 }
  0x67   : > { %522 = shalt.err (!%p519_p5)
}
  0x68   : > { %s523_s23 = scalar_lea.hbm %s795_s7, 1024  ;;  %s527_s26 = scalar_lea.hbm %s846_s2, 2048 }
  0x69   : > { %p524_p9 = scmp.ne.s32.totalorder %s795_s7, %s523_s23  ;;  %p528_p3 = scmp.lt.u32.totalorder %s795_s7, %s846_s2 }
  0x6a   : > { %p529_p7 = scmp.lt.u32.totalorder %s527_s26, %s523_s23  ;;  %p531_p13 = scmp.lt.u32.totalorder %s523_s23, %s795_s7 }
  0x6b   : > { %p525_p1 = pnand %p524_p9, %p718_p10 }
  0x6c   : > { %p530_p4 = por %p529_p7, %p528_p3 }
  0x6d   : > { %p526_p2 = pneg %p525_p1 }
  0x6e   : > { %p532_p6 = por %p531_p13, %p530_p4 }
  0x70   : > { %p533_p8 = pnand %p532_p6, %p526_p2 }
  0x72   : > { %536 = shalt.err (!%p533_p8)
}
  0x73   : > { %s602_s22 = smov 128   ;;  %s603_s17 = smov 8  }
  0x74   : > { %380 = dma.vmem_to_hbm [thread:$0]  (%p718_p10), %s790_s21, 1024, %s795_s7, %s239_s4, %s602_s22, %s602_s22, %s603_s17  }
  0x75 PF: > { %s269_s6 = sand.u32 1, %s575_s9   ;;  %p864_p12 = scmp.ne.s32.totalorder %s854_s20, 0 }
  0x76   : > { %p865_p11 = scmp.ge.s32.totalorder %s595_s14, 2  ;;  %s270_s12 = scalar_lea.sflag [#allocation4], %s269_s6 }
  0x78   : > { %p391_p0 = pnand %p865_p11, %p864_p12 }
  0x7a   : > { %570 = dma.done.wait (!%p391_p0), %s270_s12, 1024  }
  0x7b   : > { %572 = vsyncadd (!%p391_p0), %s270_s12, 4294966272  ;;  %s19_s14 = sadd.s32 1, %s595_s14   ;;  %s866_s9 = smov %s579_s10 }
  0x7c   : > { %p16_p5 = scmp.ge.s32.totalorder %s19_s14, 4   ;;  %s867_s10 = smov %s583_s11 }
  0x7d   : > { %s868_s11 = smov %s727_s28  ;;  %s869_s12 = smov %s591_s13 }
  0x7e   : > { %s870_s13 = smov %s872_s25  ;;  %18 = sbr.rel (!%p16_p5) target bundleno = 7 (0x7), region = 79 }
  0x85   :  { %275 = vsyncpa [#allocation3], 1 }
  0x86   :  { %277 = vsyncpa [#allocation3 + $0x1], 1 }
  0x87   :  { %278 = vsyncpa [#allocation6], 1 }
  0x88   :  { %280 = vsyncpa [#allocation6 + $0x1], 1 }
  0x89   :  { %281 = vsyncpa [#allocation4], 1 }
  0x8a   :  { %283 = vsyncpa [#allocation4 + $0x1], 1 }

</bundles_post_ra>
